<compile_context>
chip_gen: v5e
topology: v5e:2x2
jax: 0.10.0
libtpu: 0.0.40
codegen_flags: <defaults>
</compile_context>

<pallas_src>
import jax
import jax.numpy as jnp
from jax.experimental import pallas as pl
from jax.experimental.pallas import tpu as pltpu


def _round_up(x, m):
    return (x + m - 1) // m * m


def biaffine_kernel(x_ref, w_ref, r_ref, fb_ref, out_ref):
    # x_ref  : (TM, Wpack)       packed rows: [deps | 1 | heads | 0-pad]
    # w_ref  : (Wpack, 2*HOpad)  block-diagonal fused weight
    #                              cols [0, HOpad):       first2 = deps@K + second_bias
    #                              cols [HOpad, 2*HOpad): heads replicated per o
    # r_ref  : (HOpad, Opad)     segment-sum over h (zero pad rows / cols)
    # fb_ref : (Wpack, Opad)     first_bias rows + label_bias row (via the 1-lane)
    # out_ref: (TM, Opad)        lane-dense output slab, compute dtype
    x = x_ref[...]
    ho = w_ref.shape[1] // 2

    # One MXU dot produces both halves (block-diagonal weight), f32 accumulate.
    y = jnp.dot(x, w_ref[...], preferred_element_type=jnp.float32)
    first2 = y[:, :ho]            # 128-aligned value slice: no relayout
    heads_rep = y[:, ho:]

    # Elementwise product in f32 (v5e VPU has no bf16 ALUs), one rounding to
    # the compute dtype before the MXU segment-sum over h.
    prod = (first2 * heads_rep).astype(r_ref.dtype)

    ans = jnp.dot(prod, r_ref[...], preferred_element_type=jnp.float32)
    ans = ans + jnp.dot(x, fb_ref[...], preferred_element_type=jnp.float32)
    out_ref[...] = ans.astype(out_ref.dtype)


def pack_biaffine_params(kernel, first_bias, second_bias, label_bias,
                         *, compute_dtype=jnp.bfloat16):
    """Builds the fused / padded weight operands once per parameter set."""
    D, HO_raw = kernel.shape
    O = label_bias.shape[-1]
    H = HO_raw // O
    assert first_bias.shape == (D, O) and second_bias.shape == (H, O)

    PH = D + 1                          # heads start lane (deps + const-1 lane)
    Wpack = _round_up(PH + H, 128)      # packed input lane width (128 here)
    HOpad = _round_up(H * O, 128)       # interleaved (o, h) lane width
    Opad = _round_up(O, 128)            # lane-dense output width

    f32 = jnp.float32
    K = kernel.astype(f32).reshape(D, H, O)             # K[d, h, o]
    w_top = K.transpose(0, 2, 1).reshape(D, H * O)      # [d, o*H + h]
    sb_row = second_bias.astype(f32).T.reshape(H * O)   # [o*H + h] = second_bias[h, o]
    rep = jnp.tile(jnp.eye(H, dtype=f32), (1, O))       # [h', o*H + h] = delta(h', h)

    w_big = jnp.zeros((Wpack, 2 * HOpad), dtype=f32)
    w_big = w_big.at[:D, :H * O].set(w_top)
    w_big = w_big.at[D, :H * O].set(sb_row)
    w_big = w_big.at[PH:PH + H, HOpad:HOpad + H * O].set(rep)

    r_seg = jnp.zeros((HOpad, Opad), dtype=f32)
    r_seg = r_seg.at[:H * O, :].set(
        jnp.repeat(jnp.eye(O, Opad, dtype=f32), H, axis=0))

    fb = jnp.zeros((Wpack, Opad), dtype=f32)
    fb = fb.at[:D, :O].set(first_bias.astype(f32))
    fb = fb.at[D, :O].set(label_bias.astype(f32))

    return dict(
        w_big=w_big.astype(compute_dtype),
        r_seg=r_seg.astype(compute_dtype),
        fb=fb.astype(compute_dtype),
        dims=(D, H, O, PH, Wpack, HOpad, Opad),
        compute_dtype=compute_dtype,
    )


def biaffine_apply(deps, heads, packed, *, tm=1024):
    """Applies the biaffine layer using pre-packed parameters."""
    D, H, O, PH, Wpack, HOpad, Opad = packed["dims"]
    cd = packed["compute_dtype"]
    lead_shape = deps.shape[:-1]
    assert deps.shape[-1] == D and heads.shape[-1] == H

    deps2 = deps.reshape(-1, D)
    heads2 = heads.reshape(-1, H)
    N = deps2.shape[0]

    # Row tile: multiple of 8, auto-shrunk for small inputs.
    # TODO(synk): on v7x (2 TensorCores) prefer an even number of >=2 grid
    # steps for megacore sharding of the "parallel" axis; kept chip-agnostic
    # here since splitting costs a pure-overhead step on v5e/v6e.
    tm_eff = max(8, min(_round_up(tm, 8), _round_up(N, 8)))
    Npad = _round_up(N, tm_eff)
    num_steps = Npad // tm_eff

    # Packed lane-dense input: [deps | 1 | heads | zero pad]; padded rows are
    # all-zero (so they produce zero output) and are sliced away afterwards.
    ones = jnp.ones((N, 1), dtype=cd)
    x = jnp.concatenate(
        [deps2.astype(cd), ones, heads2.astype(cd),
         jnp.zeros((N, Wpack - PH - H), dtype=cd)], axis=1)
    x = jnp.pad(x, ((0, Npad - N), (0, 0)))

    # Realistic per-step VMEM footprint: double-buffered row/out streams,
    # (double-buffered) resident weights, and f32 temporaries.
    cb = jnp.dtype(cd).itemsize
    step_bytes = (2 * tm_eff * (Wpack + Opad) * cb
                  + 2 * (Wpack * 2 * HOpad + HOpad * Opad + Wpack * Opad) * cb
                  + tm_eff * 2 * HOpad * 4          # y (f32)
                  + tm_eff * HOpad * (4 + cb)       # prod (f32 + cast copy)
                  + tm_eff * Opad * 4)              # ans (f32)
    vmem_limit = int(min(max(2 * step_bytes, 8 * 1024 * 1024),
                         64 * 1024 * 1024))

    out2 = pl.pallas_call(
        biaffine_kernel,
        out_shape=jax.ShapeDtypeStruct((Npad, Opad), cd),
        grid=(num_steps,),
        in_specs=[
            pl.BlockSpec((tm_eff, Wpack), lambda i: (i, 0)),      # packed rows
            pl.BlockSpec((Wpack, 2 * HOpad), lambda i: (0, 0)),   # fused weight
            pl.BlockSpec((HOpad, Opad), lambda i: (0, 0)),        # segment-sum
            pl.BlockSpec((Wpack, Opad), lambda i: (0, 0)),        # first/label bias
        ],
        out_specs=pl.BlockSpec((tm_eff, Opad), lambda i: (i, 0)),
        compiler_params=pltpu.CompilerParams(
            dimension_semantics=("parallel",),
            vmem_limit_bytes=vmem_limit),
    )(x, packed["w_big"], packed["r_seg"], packed["fb"])

    # TODO(synk): an in-kernel (TM, O) -> (TM//8, 128) row-pack would shrink the
    # writeback a further 8x, but sublane->lane reshape lowering is fragile;
    # keep the lane-dense bf16 slab plus this cheap slice/cast instead.
    return out2[:N, :O].astype(deps.dtype).reshape(lead_shape + (O,))


def biaffine_forward(deps, heads, kernel, first_bias, second_bias, label_bias,
                     *, tm=1024, compute_dtype=jnp.bfloat16):
    """Convenience one-shot wrapper (packs params, then applies)."""
    packed = pack_biaffine_params(kernel, first_bias, second_bias, label_bias,
                                  compute_dtype=compute_dtype)
    return biaffine_apply(deps, heads, packed, tm=tm)


def biaffine_ref(deps, heads, kernel, first_bias, second_bias, label_bias):
    """Pure-JAX f32 reference mirroring the PyTorch forward exactly."""
    lead_shape = deps.shape[:-1]
    D = deps.shape[-1]
    H = heads.shape[-1]
    O = label_bias.shape[-1]
    d2 = deps.reshape(-1, D)
    h2 = heads.reshape(-1, H)
    first = (d2 @ kernel).reshape(-1, H, O)
    ans = jnp.einsum('bdh,bd->bh', first, h2)
    ans = ans + d2 @ first_bias
    ans = ans + h2 @ second_bias
    ans = ans + label_bias
    return ans.reshape(lead_shape + (O,))


if __name__ == "__main__":
    B, L = 2, 8            # batch, sequence length
    deps_dim, heads_dim, output_dim = 32, 32, 16

    key = jax.random.PRNGKey(0)
    k_deps, k_heads, k_ker, k_fb, k_sb, k_d2, k_h2 = jax.random.split(key, 7)

    deps = jax.random.normal(k_deps, (B, L, deps_dim), dtype=jnp.float32)
    heads = jax.random.normal(k_heads, (B, L, heads_dim), dtype=jnp.float32)

    # Parameters (deterministic, in-script). kernel uses xavier-normal scale as
    # in the module; biases get small random values to exercise all paths
    # (the PyTorch __init__ leaves them at zero).
    xavier_std = (2.0 / (deps_dim + heads_dim * output_dim)) ** 0.5
    kernel = xavier_std * jax.random.normal(
        k_ker, (deps_dim, heads_dim * output_dim), dtype=jnp.float32)
    first_bias = 0.02 * jax.random.normal(
        k_fb, (deps_dim, output_dim), dtype=jnp.float32)
    second_bias = 0.02 * jax.random.normal(
        k_sb, (heads_dim, output_dim), dtype=jnp.float32)
    label_bias = jnp.full((output_dim,), 0.01, dtype=jnp.float32)

    ref = biaffine_ref(deps, heads, kernel, first_bias, second_bias, label_bias)

    # Hoisted parameter packing (built once, reused across forward calls).
    packed_f32 = pack_biaffine_params(kernel, first_bias, second_bias,
                                      label_bias, compute_dtype=jnp.float32)
    packed_bf16 = pack_biaffine_params(kernel, first_bias, second_bias,
                                       label_bias, compute_dtype=jnp.bfloat16)

    # f32-operand path: fidelity check against the f32 reference.
    out_f32 = biaffine_apply(deps, heads, packed_f32, tm=1024)
    out_f32 = jax.block_until_ready(out_f32)
    assert out_f32.shape == (B, L, output_dim)
    assert jnp.allclose(out_f32, ref, rtol=2e-4, atol=2e-4), "f32 mismatch"

    # bf16-operand path (default / fast MXU + low-HBM path on v6e & v7x).
    out_bf16 = biaffine_apply(deps, heads, packed_bf16, tm=1024)
    out_bf16 = jax.block_until_ready(out_bf16)
    assert jnp.allclose(out_bf16, ref, rtol=2e-2, atol=6e-2), "bf16 mismatch"

    # Ragged row count: exercises row padding + a multi-step grid, reusing the
    # same packed parameters.
    B2, L2 = 3, 37
    deps_b = jax.random.normal(k_d2, (B2, L2, deps_dim), dtype=jnp.float32)
    heads_b = jax.random.normal(k_h2, (B2, L2, heads_dim), dtype=jnp.float32)
    out_b = biaffine_apply(deps_b, heads_b, packed_bf16, tm=64)
    out_b = jax.block_until_ready(out_b)
    ref_b = biaffine_ref(deps_b, heads_b, kernel, first_bias, second_bias,
                         label_bias)
    assert out_b.shape == (B2, L2, output_dim)
    assert jnp.allclose(out_b, ref_b, rtol=2e-2, atol=6e-2), "ragged mismatch"

    print("KERNEL_OK")
</pallas_src>

<mosaic_0001>
module attributes {stable_mosaic.version = 11 : i64} {
  func.func @biaffine_kernel(%arg0: i32, %arg1: memref<16x128xf32, #tpu.memory_space<vmem>>, %arg2: memref<128x1024xf32, #tpu.memory_space<vmem>>, %arg3: memref<512x128xf32, #tpu.memory_space<vmem>>, %arg4: memref<128x128xf32, #tpu.memory_space<vmem>>, %arg5: memref<16x128xf32, #tpu.memory_space<vmem>>) attributes {dimension_semantics = [#tpu.dimension_semantics<parallel>], iteration_bounds = array<i64: 1>, scalar_prefetch = 0 : i64, scratch_operands = 0 : i64, tpu.core_type = #tpu.core_type<tc>, window_params = [{transform_indices = @transform_0, window_bounds = array<i64: 16, 128>}, {pipeline_mode = #tpu.pipeline_mode<synchronous>, transform_indices = @transform_1, window_bounds = array<i64: 128, 1024>}, {pipeline_mode = #tpu.pipeline_mode<synchronous>, transform_indices = @transform_2, window_bounds = array<i64: 512, 128>}, {pipeline_mode = #tpu.pipeline_mode<synchronous>, transform_indices = @transform_3, window_bounds = array<i64: 128, 128>}, {transform_indices = @transform_4, window_bounds = array<i64: 16, 128>}]} {
    %c0 = arith.constant 0 : index
    %c0_0 = arith.constant 0 : index
    %0 = vector.load %arg1[%c0, %c0_0] : memref<16x128xf32, #tpu.memory_space<vmem>>, vector<16x128xf32>
    %c0_1 = arith.constant 0 : index
    %c0_2 = arith.constant 0 : index
    %1 = vector.load %arg2[%c0_1, %c0_2] : memref<128x1024xf32, #tpu.memory_space<vmem>>, vector<128x1024xf32>
    %cst = arith.constant dense<0.000000e+00> : vector<16x1024xf32>
    %2 = tpu.matmul %0, %1, %cst {dimension_numbers = #tpu.dot_dimension_numbers<[1], [0], [0], [1], [0, 0, 1, 1], [], []>} : vector<16x128xf32>, vector<128x1024xf32>, vector<16x1024xf32> -> vector<16x1024xf32>
    %3 = vector.extract_strided_slice %2 {offsets = [0, 0], sizes = [16, 512], strides = [1, 1]} : vector<16x1024xf32> to vector<16x512xf32>
    %4 = vector.extract_strided_slice %2 {offsets = [0, 512], sizes = [16, 512], strides = [1, 1]} : vector<16x1024xf32> to vector<16x512xf32>
    %5 = arith.mulf %3, %4 : vector<16x512xf32>
    %c0_3 = arith.constant 0 : index
    %c0_4 = arith.constant 0 : index
    %6 = vector.load %arg3[%c0_3, %c0_4] : memref<512x128xf32, #tpu.memory_space<vmem>>, vector<512x128xf32>
    %cst_5 = arith.constant dense<0.000000e+00> : vector<16x128xf32>
    %7 = tpu.matmul %5, %6, %cst_5 {dimension_numbers = #tpu.dot_dimension_numbers<[1], [0], [0], [1], [0, 0, 1, 1], [], []>} : vector<16x512xf32>, vector<512x128xf32>, vector<16x128xf32> -> vector<16x128xf32>
    %c0_6 = arith.constant 0 : index
    %c0_7 = arith.constant 0 : index
    %8 = vector.load %arg4[%c0_6, %c0_7] : memref<128x128xf32, #tpu.memory_space<vmem>>, vector<128x128xf32>
    %cst_8 = arith.constant dense<0.000000e+00> : vector<16x128xf32>
    %9 = tpu.matmul %0, %8, %cst_8 {dimension_numbers = #tpu.dot_dimension_numbers<[1], [0], [0], [1], [0, 0, 1, 1], [], []>} : vector<16x128xf32>, vector<128x128xf32>, vector<16x128xf32> -> vector<16x128xf32>
    %10 = arith.addf %7, %9 : vector<16x128xf32>
    %c0_9 = arith.constant 0 : index
    %c0_10 = arith.constant 0 : index
    %11 = vector.load %arg5[%c0_9, %c0_10] : memref<16x128xf32, #tpu.memory_space<vmem>>, vector<16x128xf32>
    tpu.vector_store %arg5[%c0_9, %c0_10], %10 {strides = array<i32>} : memref<16x128xf32, #tpu.memory_space<vmem>>, vector<16x128xf32>,
    return
  }
  func.func @transform_0(%arg0: i32) -> (i32, i32) {
    %c0_i32 = arith.constant 0 : i32
    %c0_i32_0 = arith.constant 0 : i32
    return %arg0, %c0_i32 : i32, i32
  }
  func.func @transform_1(%arg0: i32) -> (i32, i32) {
    %c0_i32 = arith.constant 0 : i32
    %c0_i32_0 = arith.constant 0 : i32
    %c0_i32_1 = arith.constant 0 : i32
    return %c0_i32, %c0_i32_0 : i32, i32
  }
  func.func @transform_2(%arg0: i32) -> (i32, i32) {
    %c0_i32 = arith.constant 0 : i32
    %c0_i32_0 = arith.constant 0 : i32
    %c0_i32_1 = arith.constant 0 : i32
    return %c0_i32, %c0_i32_0 : i32, i32
  }
  func.func @transform_3(%arg0: i32) -> (i32, i32) {
    %c0_i32 = arith.constant 0 : i32
    %c0_i32_0 = arith.constant 0 : i32
    %c0_i32_1 = arith.constant 0 : i32
    return %c0_i32, %c0_i32_0 : i32, i32
  }
  func.func @transform_4(%arg0: i32) -> (i32, i32) {
    %c0_i32 = arith.constant 0 : i32
    %c0_i32_0 = arith.constant 0 : i32
    return %arg0, %c0_i32 : i32, i32
  }
}

</mosaic_0001>

<bundles_post_ra>
// kernel: tpu_custom_call.1
= control target key start
LH: loop header
LB: loop body
LE: loop exit
PB: predicated region body
PF: predicated region fallthrough
CT: control target
= control target key end

     0   :  { %9 = vsyncpa [#allocation3], 0  ;;  %s857_s0 = inlined_call_operand.hbm [shape: f32[16,128], index: 0, kind: input, shape index: {}]   ;;  %s858_s1 = inlined_call_operand.hbm [shape: f32[128,1024], index: 1, kind: input, shape index: {}]   ;;  %s859_s2 = inlined_call_operand.hbm [shape: f32[512,128], index: 2, kind: input, shape index: {}]   ;;  %s860_s3 = inlined_call_operand.hbm [shape: f32[128,128], index: 3, kind: input, shape index: {}]   ;;  %s861_s4 = inlined_call_operand.hbm [shape: f32[16,128], index: 4, kind: output, shape index: {}]  }
   0x1   :  { %10 = vsyncpa [#allocation6], 0 }
   0x2   :  { %11 = vsyncpa [#allocation9], 0  ;;  %s30_s17 = sshll.u32 %s858_s1, 4  ;;  %s31_s17 = int_to_ptr.hbm [resolvable:$true] %s30_s17 }
   0x3   :  { %12 = vsyncpa [#allocation4], 0  ;;  %s774_s18 = smov [#allocation5]   ;;  %s17_s22 = sshll.u32 %s857_s0, 4  ;;  %s18_s22 = int_to_ptr.hbm [resolvable:$true] %s17_s22 }
   0x4   :  { %s32_s19 = sshll.u32 %s774_s18, 4  ;;  %s775_s23 = smov 1024   ;;  %s33_s19 = int_to_ptr.vmem [resolvable:$true] %s32_s19 }
   0x5   :  { %s776_s24 = smov 64   ;;  %s777_s25 = smov [#allocation2]  }
   0x6   :  { %38 = dma.hbm_to_vmem [thread:$0]  %s31_s17, 16384, %s33_s19, [#allocation6], %s775_s23, %s775_s23, %s776_s24  }
   0x7   :  { %s19_s26 = sshll.u32 %s777_s25, 4  ;;  %s778_s27 = smov 128   ;;  %s20_s26 = int_to_ptr.vmem [resolvable:$true] %s19_s26 }
   0x8   :  { %s779_s28 = smov 8   ;;  %s43_s30 = sshll.u32 %s859_s2, 4  ;;  %s44_s30 = int_to_ptr.hbm [resolvable:$true] %s43_s30 }
   0x9   :  { %25 = dma.hbm_to_vmem [thread:$0]  %s18_s22, 256, %s20_s26, [#allocation3], %s778_s27, %s778_s27, %s779_s28  }
   0xa   :  { %s780_s5 = smov [#allocation7]   ;;  %s56_s8 = sshll.u32 %s860_s3, 4  ;;  %s57_s8 = int_to_ptr.hbm [resolvable:$true] %s56_s8 }
   0xb   :  { %s45_s0 = sshll.u32 %s780_s5, 4  ;;  %s781_s9 = smov [#allocation8]   ;;  %s46_s0 = int_to_ptr.vmem [resolvable:$true] %s45_s0 }
   0xc   :  { %51 = dma.hbm_to_vmem [thread:$0]  %s44_s30, 8192, %s46_s0, [#allocation6], %s778_s27, %s778_s27, %s779_s28  }
   0xd   :  { %s58_s10 = sshll.u32 %s781_s9, 4  ;;  %s59_s10 = int_to_ptr.vmem [resolvable:$true] %s58_s10 }
   0xe   :  { %64 = dma.hbm_to_vmem [thread:$0]  %s57_s8, 2048, %s59_s10, [#allocation9], %s778_s27, %s778_s27, %s779_s28  }
   0xf   :  { %766 = dma.done.wait [#allocation3], 256  }
  0x10   :  { %767 = vsyncadd [#allocation3], 4294967040 }
  0x11   :  { %768 = dma.done.wait [#allocation6], 24576  }
  0x12   :  { %769 = vsyncadd [#allocation6], 4294942720 }
  0x13   :  { %770 = dma.done.wait [#allocation9], 2048  }
  0x14   :  { %771 = vsyncadd [#allocation9], 4294965248  ;;  %v203_v0 = vld [vmem:[#allocation5 + $0x3c0] sm:$0xff]  ;;  %v204_v1 = vld [vmem:[#allocation5 + $0x3c8] sm:$0xff]  ;;  %s782_s2 = smov [#allocation10]   ;;  %s606_s13 = sshll.u32 %s861_s4, 4  ;;  %s607_s13 = int_to_ptr.hbm [resolvable:$true] %s606_s13 }
  0x15   :  { %v205_v2 = vld [vmem:[#allocation5 + $0x3d0] sm:$0xff]  ;;  %211 = vmatpush.msra.mxu0 %v203_v0  ;;  %234 = vmatpush.msra.mxu1 %v204_v1  ;;  %v206_v3 = vld [vmem:[#allocation5 + $0x3d8] sm:$0xff]  ;;  %v195_v4 = vld [vmem:[#allocation5 + $0x380] sm:$0xff]  ;;  %s604_s3 = sshll.u32 %s782_s2, 4  ;;  %s605_s3 = int_to_ptr.vmem [resolvable:$true] %s604_s3 }
  0x16   :  { %v196_v5 = vld [vmem:[#allocation5 + $0x388] sm:$0xff]  ;;  %257 = vmatpush.msra.mxu2 %v205_v2  ;;  %280 = vmatpush.msra.mxu3 %v206_v3  ;;  %v197_v6 = vld [vmem:[#allocation5 + $0x390] sm:$0xff]  ;;  %v198_v7 = vld [vmem:[#allocation5 + $0x398] sm:$0xff] }
  0x17   :  { %v187_v8 = vld [vmem:[#allocation5 + $0x340] sm:$0xff]  ;;  %212 = vmatpush.msra.mxu0 %v195_v4  ;;  %235 = vmatpush.msra.mxu1 %v196_v5  ;;  %v188_v9 = vld [vmem:[#allocation5 + $0x348] sm:$0xff]  ;;  %v189_v10 = vld [vmem:[#allocation5 + $0x350] sm:$0xff] }
  0x18   :  { %v190_v11 = vld [vmem:[#allocation5 + $0x358] sm:$0xff]  ;;  %258 = vmatpush.msra.mxu2 %v197_v6  ;;  %281 = vmatpush.msra.mxu3 %v198_v7  ;;  %v179_v12 = vld [vmem:[#allocation5 + $0x300] sm:$0xff]  ;;  %v180_v13 = vld [vmem:[#allocation5 + $0x308] sm:$0xff] }
  0x19   :  { %213 = vmatpush.msra.mxu0 %v187_v8  ;;  %236 = vmatpush.msra.mxu1 %v188_v9  ;;  %v181_v14 = vld [vmem:[#allocation5 + $0x310] sm:$0xff]  ;;  %v182_v15 = vld [vmem:[#allocation5 + $0x318] sm:$0xff]  ;;  %v171_v16 = vld [vmem:[#allocation5 + $0x2c0] sm:$0xff] }
  0x1a   :  { %259 = vmatpush.msra.mxu2 %v189_v10  ;;  %282 = vmatpush.msra.mxu3 %v190_v11  ;;  %v172_v17 = vld [vmem:[#allocation5 + $0x2c8] sm:$0xff]  ;;  %v173_v18 = vld [vmem:[#allocation5 + $0x2d0] sm:$0xff]  ;;  %v174_v19 = vld [vmem:[#allocation5 + $0x2d8] sm:$0xff] }
  0x1b   :  { %214 = vmatpush.msra.mxu0 %v179_v12  ;;  %237 = vmatpush.msra.mxu1 %v180_v13  ;;  %v163_v20 = vld [vmem:[#allocation5 + $0x280] sm:$0xff]  ;;  %v164_v21 = vld [vmem:[#allocation5 + $0x288] sm:$0xff]  ;;  %v165_v22 = vld [vmem:[#allocation5 + $0x290] sm:$0xff] }
  0x1c   :  { %260 = vmatpush.msra.mxu2 %v181_v14  ;;  %283 = vmatpush.msra.mxu3 %v182_v15  ;;  %v166_v23 = vld [vmem:[#allocation5 + $0x298] sm:$0xff]  ;;  %v155_v24 = vld [vmem:[#allocation5 + $0x240] sm:$0xff]  ;;  %v156_v25 = vld [vmem:[#allocation5 + $0x248] sm:$0xff] }
  0x1d   :  { %215 = vmatpush.msra.mxu0 %v171_v16  ;;  %238 = vmatpush.msra.mxu1 %v172_v17  ;;  %v157_v26 = vld [vmem:[#allocation5 + $0x250] sm:$0xff]  ;;  %v158_v27 = vld [vmem:[#allocation5 + $0x258] sm:$0xff]  ;;  %v147_v28 = vld [vmem:[#allocation5 + $0x200] sm:$0xff] }
  0x1e   :  { %261 = vmatpush.msra.mxu2 %v173_v18  ;;  %284 = vmatpush.msra.mxu3 %v174_v19  ;;  %v148_v29 = vld [vmem:[#allocation5 + $0x208] sm:$0xff]  ;;  %v149_v30 = vld [vmem:[#allocation5 + $0x210] sm:$0xff]  ;;  %v150_v31 = vld [vmem:[#allocation5 + $0x218] sm:$0xff] }
  0x1f   :  { %216 = vmatpush.msra.mxu0 %v163_v20  ;;  %239 = vmatpush.msra.mxu1 %v164_v21  ;;  %v139_v32 = vld [vmem:[#allocation5 + $0x1c0] sm:$0xff]  ;;  %v140_v33 = vld [vmem:[#allocation5 + $0x1c8] sm:$0xff]  ;;  %v141_v34 = vld [vmem:[#allocation5 + $0x1d0] sm:$0xff] }
  0x20   :  { %262 = vmatpush.msra.mxu2 %v165_v22  ;;  %285 = vmatpush.msra.mxu3 %v166_v23  ;;  %v142_v35 = vld [vmem:[#allocation5 + $0x1d8] sm:$0xff]  ;;  %v131_v36 = vld [vmem:[#allocation5 + $0x180] sm:$0xff]  ;;  %v132_v37 = vld [vmem:[#allocation5 + $0x188] sm:$0xff] }
  0x21   :  { %217 = vmatpush.msra.mxu0 %v155_v24  ;;  %240 = vmatpush.msra.mxu1 %v156_v25  ;;  %v133_v38 = vld [vmem:[#allocation5 + $0x190] sm:$0xff]  ;;  %v134_v39 = vld [vmem:[#allocation5 + $0x198] sm:$0xff]  ;;  %v123_v40 = vld [vmem:[#allocation5 + $0x140] sm:$0xff] }
  0x22   :  { %263 = vmatpush.msra.mxu2 %v157_v26  ;;  %286 = vmatpush.msra.mxu3 %v158_v27  ;;  %v124_v41 = vld [vmem:[#allocation5 + $0x148] sm:$0xff]  ;;  %v125_v42 = vld [vmem:[#allocation5 + $0x150] sm:$0xff]  ;;  %v126_v43 = vld [vmem:[#allocation5 + $0x158] sm:$0xff] }
  0x23   :  { %218 = vmatpush.msra.mxu0 %v147_v28  ;;  %241 = vmatpush.msra.mxu1 %v148_v29  ;;  %v115_v44 = vld [vmem:[#allocation5 + $0x100] sm:$0xff]  ;;  %v116_v45 = vld [vmem:[#allocation5 + $0x108] sm:$0xff]  ;;  %v117_v46 = vld [vmem:[#allocation5 + $0x110] sm:$0xff] }
  0x24   :  { %264 = vmatpush.msra.mxu2 %v149_v30  ;;  %287 = vmatpush.msra.mxu3 %v150_v31  ;;  %v118_v47 = vld [vmem:[#allocation5 + $0x118] sm:$0xff]  ;;  %v107_v48 = vld [vmem:[#allocation5 + $0xc0] sm:$0xff]  ;;  %v108_v49 = vld [vmem:[#allocation5 + $0xc8] sm:$0xff] }
  0x25   :  { %219 = vmatpush.msra.mxu0 %v139_v32  ;;  %242 = vmatpush.msra.mxu1 %v140_v33  ;;  %v109_v50 = vld [vmem:[#allocation5 + $0xd0] sm:$0xff]  ;;  %v110_v51 = vld [vmem:[#allocation5 + $0xd8] sm:$0xff]  ;;  %v99_v52 = vld [vmem:[#allocation5 + $0x80] sm:$0xff] }
  0x26   :  { %265 = vmatpush.msra.mxu2 %v141_v34  ;;  %288 = vmatpush.msra.mxu3 %v142_v35  ;;  %v100_v53 = vld [vmem:[#allocation5 + $0x88] sm:$0xff]  ;;  %v101_v54 = vld [vmem:[#allocation5 + $0x90] sm:$0xff]  ;;  %v102_v55 = vld [vmem:[#allocation5 + $0x98] sm:$0xff] }
  0x27   :  { %220 = vmatpush.msra.mxu0 %v131_v36  ;;  %243 = vmatpush.msra.mxu1 %v132_v37  ;;  %v91_v56 = vld [vmem:[#allocation5 + $0x40] sm:$0xff]  ;;  %v92_v57 = vld [vmem:[#allocation5 + $0x48] sm:$0xff]  ;;  %v93_v58 = vld [vmem:[#allocation5 + $0x50] sm:$0xff] }
  0x28   :  { %266 = vmatpush.msra.mxu2 %v133_v38  ;;  %289 = vmatpush.msra.mxu3 %v134_v39  ;;  %v94_v59 = vld [vmem:[#allocation5 + $0x58] sm:$0xff]  ;;  %v83_v60 = vld [vmem:[#allocation5] sm:$0xff]  ;;  %v84_v61 = vld [vmem:[#allocation5 + $0x8] sm:$0xff] }
  0x29   :  { %221 = vmatpush.msra.mxu0 %v123_v40  ;;  %244 = vmatpush.msra.mxu1 %v124_v41  ;;  %v85_v62 = vld [vmem:[#allocation5 + $0x10] sm:$0xff]  ;;  %v86_v63 = vld [vmem:[#allocation5 + $0x18] sm:$0xff]  ;;  %v207_v0 = vld [vmem:[#allocation5 + $0x3e0] sm:$0xff] }
  0x2a   :  { %267 = vmatpush.msra.mxu2 %v125_v42  ;;  %290 = vmatpush.msra.mxu3 %v126_v43  ;;  %v208_v1 = vld [vmem:[#allocation5 + $0x3e8] sm:$0xff]  ;;  %v209_v2 = vld [vmem:[#allocation5 + $0x3f0] sm:$0xff]  ;;  %v210_v3 = vld [vmem:[#allocation5 + $0x3f8] sm:$0xff] }
  0x2b   :  { %222 = vmatpush.msra.mxu0 %v115_v44  ;;  %245 = vmatpush.msra.mxu1 %v116_v45  ;;  %v199_v4 = vld [vmem:[#allocation5 + $0x3a0] sm:$0xff]  ;;  %v200_v5 = vld [vmem:[#allocation5 + $0x3a8] sm:$0xff]  ;;  %v201_v6 = vld [vmem:[#allocation5 + $0x3b0] sm:$0xff] }
  0x2c   :  { %268 = vmatpush.msra.mxu2 %v117_v46  ;;  %291 = vmatpush.msra.mxu3 %v118_v47  ;;  %v202_v7 = vld [vmem:[#allocation5 + $0x3b8] sm:$0xff]  ;;  %v191_v8 = vld [vmem:[#allocation5 + $0x360] sm:$0xff]  ;;  %v192_v9 = vld [vmem:[#allocation5 + $0x368] sm:$0xff] }
  0x2d   :  { %223 = vmatpush.msra.mxu0 %v107_v48  ;;  %246 = vmatpush.msra.mxu1 %v108_v49  ;;  %v193_v10 = vld [vmem:[#allocation5 + $0x370] sm:$0xff]  ;;  %v194_v11 = vld [vmem:[#allocation5 + $0x378] sm:$0xff]  ;;  %v183_v12 = vld [vmem:[#allocation5 + $0x320] sm:$0xff] }
  0x2e   :  { %269 = vmatpush.msra.mxu2 %v109_v50  ;;  %292 = vmatpush.msra.mxu3 %v110_v51  ;;  %v184_v13 = vld [vmem:[#allocation5 + $0x328] sm:$0xff]  ;;  %v185_v14 = vld [vmem:[#allocation5 + $0x330] sm:$0xff]  ;;  %v186_v15 = vld [vmem:[#allocation5 + $0x338] sm:$0xff] }
  0x2f   :  { %224 = vmatpush.msra.mxu0 %v99_v52  ;;  %247 = vmatpush.msra.mxu1 %v100_v53  ;;  %v175_v16 = vld [vmem:[#allocation5 + $0x2e0] sm:$0xff]  ;;  %v176_v17 = vld [vmem:[#allocation5 + $0x2e8] sm:$0xff]  ;;  %v177_v18 = vld [vmem:[#allocation5 + $0x2f0] sm:$0xff] }
  0x30   :  { %270 = vmatpush.msra.mxu2 %v101_v54  ;;  %293 = vmatpush.msra.mxu3 %v102_v55  ;;  %v178_v19 = vld [vmem:[#allocation5 + $0x2f8] sm:$0xff]  ;;  %v167_v20 = vld [vmem:[#allocation5 + $0x2a0] sm:$0xff]  ;;  %v168_v21 = vld [vmem:[#allocation5 + $0x2a8] sm:$0xff] }
  0x31   :  { %225 = vmatpush.msra.mxu0 %v91_v56  ;;  %248 = vmatpush.msra.mxu1 %v92_v57  ;;  %v169_v22 = vld [vmem:[#allocation5 + $0x2b0] sm:$0xff]  ;;  %v170_v23 = vld [vmem:[#allocation5 + $0x2b8] sm:$0xff]  ;;  %v159_v24 = vld [vmem:[#allocation5 + $0x260] sm:$0xff] }
  0x32   :  { %271 = vmatpush.msra.mxu2 %v93_v58  ;;  %294 = vmatpush.msra.mxu3 %v94_v59  ;;  %v160_v25 = vld [vmem:[#allocation5 + $0x268] sm:$0xff]  ;;  %v161_v26 = vld [vmem:[#allocation5 + $0x270] sm:$0xff]  ;;  %v162_v27 = vld [vmem:[#allocation5 + $0x278] sm:$0xff] }
  0x33   :  { %226 = vmatpush.msra.mxu0 %v83_v60  ;;  %249 = vmatpush.msra.mxu1 %v84_v61  ;;  %v151_v28 = vld [vmem:[#allocation5 + $0x220] sm:$0xff]  ;;  %v152_v29 = vld [vmem:[#allocation5 + $0x228] sm:$0xff]  ;;  %v153_v30 = vld [vmem:[#allocation5 + $0x230] sm:$0xff] }
  0x34   :  { %272 = vmatpush.msra.mxu2 %v85_v62  ;;  %295 = vmatpush.msra.mxu3 %v86_v63  ;;  %v154_v31 = vld [vmem:[#allocation5 + $0x238] sm:$0xff]  ;;  %v829_v32 = vld [vmem:[#allocation2] sm:$0xff]  ;;  %v143_v33 = vld [vmem:[#allocation5 + $0x1e0] sm:$0xff] }
  0x35   :  { %303 = vmatpush.msrb.mxu0 %v207_v0  ;;  %326 = vmatpush.msrb.mxu1 %v208_v1  ;;  %v144_v34 = vld [vmem:[#allocation5 + $0x1e8] sm:$0xff]  ;;  %v145_v35 = vld [vmem:[#allocation5 + $0x1f0] sm:$0xff]  ;;  %v146_v36 = vld [vmem:[#allocation5 + $0x1f8] sm:$0xff] }
  0x36   :  { %349 = vmatpush.msrb.mxu2 %v209_v2  ;;  %372 = vmatpush.msrb.mxu3 %v210_v3  ;;  %v135_v37 = vld [vmem:[#allocation5 + $0x1a0] sm:$0xff]  ;;  %v136_v38 = vld [vmem:[#allocation5 + $0x1a8] sm:$0xff]  ;;  %v137_v39 = vld [vmem:[#allocation5 + $0x1b0] sm:$0xff] }
  0x37   :  { %304 = vmatpush.msrb.mxu0 %v199_v4  ;;  %327 = vmatpush.msrb.mxu1 %v200_v5  ;;  %v138_v40 = vld [vmem:[#allocation5 + $0x1b8] sm:$0xff]  ;;  %v127_v41 = vld [vmem:[#allocation5 + $0x160] sm:$0xff]  ;;  %v128_v42 = vld [vmem:[#allocation5 + $0x168] sm:$0xff] }
  0x38   :  { %350 = vmatpush.msrb.mxu2 %v201_v6  ;;  %373 = vmatpush.msrb.mxu3 %v202_v7  ;;  %v129_v43 = vld [vmem:[#allocation5 + $0x170] sm:$0xff]  ;;  %v130_v44 = vld [vmem:[#allocation5 + $0x178] sm:$0xff]  ;;  %v119_v45 = vld [vmem:[#allocation5 + $0x120] sm:$0xff] }
  0x39   :  { %305 = vmatpush.msrb.mxu0 %v191_v8  ;;  %328 = vmatpush.msrb.mxu1 %v192_v9  ;;  %v120_v46 = vld [vmem:[#allocation5 + $0x128] sm:$0xff]  ;;  %v121_v47 = vld [vmem:[#allocation5 + $0x130] sm:$0xff]  ;;  %v122_v48 = vld [vmem:[#allocation5 + $0x138] sm:$0xff] }
  0x3a   :  { %351 = vmatpush.msrb.mxu2 %v193_v10  ;;  %374 = vmatpush.msrb.mxu3 %v194_v11  ;;  %v835_v49 = vld [vmem:[#allocation2 + $0x8] sm:$0xff]  ;;  %v111_v50 = vld [vmem:[#allocation5 + $0xe0] sm:$0xff]  ;;  %v112_v51 = vld [vmem:[#allocation5 + $0xe8] sm:$0xff] }
  0x3b   :  { %306 = vmatpush.msrb.mxu0 %v183_v12  ;;  %329 = vmatpush.msrb.mxu1 %v184_v13  ;;  %v113_v52 = vld [vmem:[#allocation5 + $0xf0] sm:$0xff]  ;;  %v114_v53 = vld [vmem:[#allocation5 + $0xf8] sm:$0xff]  ;;  %v103_v54 = vld [vmem:[#allocation5 + $0xa0] sm:$0xff] }
  0x3c   :  { %352 = vmatpush.msrb.mxu2 %v185_v14  ;;  %375 = vmatpush.msrb.mxu3 %v186_v15  ;;  %v104_v55 = vld [vmem:[#allocation5 + $0xa8] sm:$0xff]  ;;  %v105_v56 = vld [vmem:[#allocation5 + $0xb0] sm:$0xff]  ;;  %v106_v57 = vld [vmem:[#allocation5 + $0xb8] sm:$0xff] }
  0x3d   :  { %307 = vmatpush.msrb.mxu0 %v175_v16  ;;  %330 = vmatpush.msrb.mxu1 %v176_v17  ;;  %v95_v58 = vld [vmem:[#allocation5 + $0x60] sm:$0xff]  ;;  %v96_v59 = vld [vmem:[#allocation5 + $0x68] sm:$0xff]  ;;  %v97_v60 = vld [vmem:[#allocation5 + $0x70] sm:$0xff] }
  0x3e   :  { %353 = vmatpush.msrb.mxu2 %v177_v18  ;;  %376 = vmatpush.msrb.mxu3 %v178_v19  ;;  %v98_v61 = vld [vmem:[#allocation5 + $0x78] sm:$0xff]  ;;  %v87_v62 = vld [vmem:[#allocation5 + $0x20] sm:$0xff]  ;;  %v88_v63 = vld [vmem:[#allocation5 + $0x28] sm:$0xff] }
  0x3f   :  { %308 = vmatpush.msrb.mxu0 %v167_v20  ;;  %331 = vmatpush.msrb.mxu1 %v168_v21  ;;  %v89_v0 = vld [vmem:[#allocation5 + $0x30] sm:$0xff]  ;;  %v90_v1 = vld [vmem:[#allocation5 + $0x38] sm:$0xff]  ;;  %v480_v9 = vld [vmem:[#allocation8 + $0x68] sm:$0xff] }
  0x40   :  { %354 = vmatpush.msrb.mxu2 %v169_v22  ;;  %377 = vmatpush.msrb.mxu3 %v170_v23  ;;  %v482_v2 = vld [vmem:[#allocation8 + $0x78] sm:$0xff]  ;;  %v481_v5 = vld [vmem:[#allocation8 + $0x70] sm:$0xff]  ;;  %v416_v10 = vld [vmem:[#allocation7 + $0x68] sm:$0xff] }
  0x41   :  { %309 = vmatpush.msrb.mxu0 %v159_v24  ;;  %332 = vmatpush.msrb.mxu1 %v160_v25  ;;  %v418_v3 = vld [vmem:[#allocation7 + $0x78] sm:$0xff]  ;;  %v417_v6 = vld [vmem:[#allocation7 + $0x70] sm:$0xff]  ;;  %v432_v11 = vld [vmem:[#allocation7 + $0xe8] sm:$0xff] }
  0x42   :  { %355 = vmatpush.msrb.mxu2 %v161_v26  ;;  %378 = vmatpush.msrb.mxu3 %v162_v27  ;;  %v434_v4 = vld [vmem:[#allocation7 + $0xf8] sm:$0xff]  ;;  %v433_v7 = vld [vmem:[#allocation7 + $0xf0] sm:$0xff]  ;;  %v448_v13 = vld [vmem:[#allocation7 + $0x168] sm:$0xff] }
  0x43   :  { %310 = vmatpush.msrb.mxu0 %v151_v28  ;;  %333 = vmatpush.msrb.mxu1 %v152_v29  ;;  %v450_v8 = vld [vmem:[#allocation7 + $0x178] sm:$0xff]  ;;  %v449_v12 = vld [vmem:[#allocation7 + $0x170] sm:$0xff]  ;;  %v479_v14 = vld [vmem:[#allocation8 + $0x60] sm:$0xff] }
  0x44   :  { %356 = vmatpush.msrb.mxu2 %v153_v30  ;;  %379 = vmatpush.msrb.mxu3 %v154_v31  ;;  %v415_v15 = vld [vmem:[#allocation7 + $0x60] sm:$0xff]  ;;  %v478_v17 = vld [vmem:[#allocation8 + $0x58] sm:$0xff]  ;;  %v477_v20 = vld [vmem:[#allocation8 + $0x50] sm:$0xff] }
  0x45   :  { %227 = vmatmul.f32.vlgmr.msra.gmra.mxu0 %v829_v32  ;;  %250 = vmatmul.f32.vlgmr.msra.gmra.mxu1 %v829_v32  ;;  %v431_v16 = vld [vmem:[#allocation7 + $0xe0] sm:$0xff]  ;;  %v414_v18 = vld [vmem:[#allocation7 + $0x58] sm:$0xff]  ;;  %v413_v21 = vld [vmem:[#allocation7 + $0x50] sm:$0xff] }
  0x46   :  { %273 = vmatmul.f32.vlgmr.msra.gmra.mxu2 %v829_v32  ;;  %296 = vmatmul.f32.vlgmr.msra.gmra.mxu3 %v829_v32  ;;  %v430_v19 = vld [vmem:[#allocation7 + $0xd8] sm:$0xff]  ;;  %v429_v22 = vld [vmem:[#allocation7 + $0xd0] sm:$0xff]  ;;  %v476_v23 = vld [vmem:[#allocation8 + $0x48] sm:$0xff] }
  0x47   :  { %311 = vmatpush.msrb.mxu0 %v143_v33  ;;  %334 = vmatpush.msrb.mxu1 %v144_v34  ;;  %v412_v24 = vld [vmem:[#allocation7 + $0x48] sm:$0xff]  ;;  %v475_v25 = vld [vmem:[#allocation8 + $0x40] sm:$0xff]  ;;  %v474_v27 = vld [vmem:[#allocation8 + $0x38] sm:$0xff] }
  0x48   :  { %357 = vmatpush.msrb.mxu2 %v145_v35  ;;  %380 = vmatpush.msrb.mxu3 %v146_v36  ;;  %v411_v26 = vld [vmem:[#allocation7 + $0x40] sm:$0xff]  ;;  %v410_v28 = vld [vmem:[#allocation7 + $0x38] sm:$0xff]  ;;  %v473_v29 = vld [vmem:[#allocation8 + $0x30] sm:$0xff] }
  0x49   :  { %312 = vmatpush.msrb.mxu0 %v135_v37  ;;  %335 = vmatpush.msrb.mxu1 %v136_v38  ;;  %v409_v30 = vld [vmem:[#allocation7 + $0x30] sm:$0xff]  ;;  %v472_v31 = vld [vmem:[#allocation8 + $0x28] sm:$0xff]  ;;  %v471_v34 = vld [vmem:[#allocation8 + $0x20] sm:$0xff] }
  0x4a   :  { %358 = vmatpush.msrb.mxu2 %v137_v39  ;;  %381 = vmatpush.msrb.mxu3 %v138_v40  ;;  %v408_v33 = vld [vmem:[#allocation7 + $0x28] sm:$0xff]  ;;  %v407_v35 = vld [vmem:[#allocation7 + $0x20] sm:$0xff]  ;;  %v470_v36 = vld [vmem:[#allocation8 + $0x18] sm:$0xff] }
  0x4b   :  { %313 = vmatpush.msrb.mxu0 %v127_v41  ;;  %336 = vmatpush.msrb.mxu1 %v128_v42  ;;  %v406_v37 = vld [vmem:[#allocation7 + $0x18] sm:$0xff]  ;;  %v469_v38 = vld [vmem:[#allocation8 + $0x10] sm:$0xff]  ;;  %v468_v40 = vld [vmem:[#allocation8 + $0x8] sm:$0xff] }
  0x4c   :  { %359 = vmatpush.msrb.mxu2 %v129_v43  ;;  %382 = vmatpush.msrb.mxu3 %v130_v44  ;;  %v405_v39 = vld [vmem:[#allocation7 + $0x10] sm:$0xff]  ;;  %v467_v41 = vld [vmem:[#allocation8] sm:$0xff]  ;;  %v466_v42 = vld [vmem:[#allocation7 + $0x1f8] sm:$0xff] }
  0x4d   :  { %314 = vmatpush.msrb.mxu0 %v119_v45  ;;  %337 = vmatpush.msrb.mxu1 %v120_v46  ;;  %v465_v43 = vld [vmem:[#allocation7 + $0x1f0] sm:$0xff]  ;;  %v464_v44 = vld [vmem:[#allocation7 + $0x1e8] sm:$0xff]  ;;  %v447_v46 = vld [vmem:[#allocation7 + $0x160] sm:$0xff] }
  0x4e   :  { %360 = vmatpush.msrb.mxu2 %v121_v47  ;;  %383 = vmatpush.msrb.mxu3 %v122_v48  ;;  %v428_v45 = vld [vmem:[#allocation7 + $0xc8] sm:$0xff]  ;;  %v463_v47 = vld [vmem:[#allocation7 + $0x1e0] sm:$0xff] }
  0x4f   :  { %230 = vmatmul.f32.gmra.mxu0 %v835_v49  ;;  %253 = vmatmul.f32.gmra.mxu1 %v835_v49  ;;  %v404_v48 = vld [vmem:[#allocation7 + $0x8] sm:$0xff] }
  0x50   :  { %276 = vmatmul.f32.gmra.mxu2 %v835_v49  ;;  %299 = vmatmul.f32.gmra.mxu3 %v835_v49 }
  0x51   :  { %315 = vmatpush.msrb.mxu0 %v111_v50  ;;  %338 = vmatpush.msrb.mxu1 %v112_v51  ;;  %v427_v50 = vld [vmem:[#allocation7 + $0xc0] sm:$0xff]  ;;  %v446_v51 = vld [vmem:[#allocation7 + $0x158] sm:$0xff] }
  0x52   :  { %361 = vmatpush.msrb.mxu2 %v113_v52  ;;  %384 = vmatpush.msrb.mxu3 %v114_v53  ;;  %v462_v52 = vld [vmem:[#allocation7 + $0x1d8] sm:$0xff]  ;;  %v403_v53 = vld [vmem:[#allocation7] sm:$0xff] }
  0x53   :  { %316 = vmatpush.msrb.mxu0 %v103_v54  ;;  %339 = vmatpush.msrb.mxu1 %v104_v55  ;;  %v426_v54 = vld [vmem:[#allocation7 + $0xb8] sm:$0xff]  ;;  %v461_v55 = vld [vmem:[#allocation7 + $0x1d0] sm:$0xff] }
  0x54   :  { %362 = vmatpush.msrb.mxu2 %v105_v56  ;;  %385 = vmatpush.msrb.mxu3 %v106_v57  ;;  %v444_v56 = vld [vmem:[#allocation7 + $0x148] sm:$0xff] }
  0x55   :  { %317 = vmatpush.msrb.mxu0 %v95_v58  ;;  %340 = vmatpush.msrb.mxu1 %v96_v59  ;;  %v460_v57 = vld [vmem:[#allocation7 + $0x1c8] sm:$0xff]  ;;  %v443_v59 = vld [vmem:[#allocation7 + $0x140] sm:$0xff] }
  0x56   :  { %363 = vmatpush.msrb.mxu2 %v97_v60  ;;  %386 = vmatpush.msrb.mxu3 %v98_v61  ;;  %v424_v58 = vld [vmem:[#allocation7 + $0xa8] sm:$0xff]  ;;  %v459_v60 = vld [vmem:[#allocation7 + $0x1c0] sm:$0xff] }
  0x57   :  { %318 = vmatpush.msrb.mxu0 %v87_v62  ;;  %341 = vmatpush.msrb.mxu1 %v88_v63  ;;  %v423_v61 = vld [vmem:[#allocation7 + $0xa0] sm:$0xff]  ;;  %v442_v62 = vld [vmem:[#allocation7 + $0x138] sm:$0xff] }
  0x58   :  { %364 = vmatpush.msrb.mxu2 %v89_v0  ;;  %387 = vmatpush.msrb.mxu3 %v90_v1  ;;  %v458_v63 = vld [vmem:[#allocation7 + $0x1b8] sm:$0xff]  ;;  %v441_v1 = vld [vmem:[#allocation7 + $0x130] sm:$0xff] }
  0x59   :  { %319 = vmatmul.f32.vlgmr.msrb.gmra.mxu0 %v829_v32  ;;  %342 = vmatmul.f32.vlgmr.msrb.gmra.mxu1 %v829_v32  ;;  %v422_v0 = vld [vmem:[#allocation7 + $0x98] sm:$0xff] }
  0x5a   :  { %365 = vmatmul.f32.vlgmr.msrb.gmra.mxu2 %v829_v32  ;;  %388 = vmatmul.f32.vlgmr.msrb.gmra.mxu3 %v829_v32 }
  0x5b   :  { %483 = vmatpush.msra.mxu0 %v482_v2  ;;  %506 = vmatpush.msra.mxu1 %v418_v3  ;;  %v457_v2 = vld [vmem:[#allocation7 + $0x1b0] sm:$0xff] }
  0x5c   :  { %529 = vmatpush.msra.mxu2 %v434_v4  ;;  %552 = vmatpush.msra.mxu3 %v450_v8  ;;  %v421_v3 = vld [vmem:[#allocation7 + $0x90] sm:$0xff]  ;;  %v440_v4 = vld [vmem:[#allocation7 + $0x128] sm:$0xff]  ;;  %v455_v8 = vld [vmem:[#allocation7 + $0x1a0] sm:$0xff] }
  0x5d   :  { %484 = vmatpush.msra.mxu0 %v481_v5  ;;  %507 = vmatpush.msra.mxu1 %v417_v6  ;;  %v456_v5 = vld [vmem:[#allocation7 + $0x1a8] sm:$0xff] }
  0x5e   :  { %530 = vmatpush.msra.mxu2 %v433_v7  ;;  %553 = vmatpush.msra.mxu3 %v449_v12  ;;  %v420_v6 = vld [vmem:[#allocation7 + $0x88] sm:$0xff]  ;;  %v439_v7 = vld [vmem:[#allocation7 + $0x120] sm:$0xff]  ;;  %v437_v12 = vld [vmem:[#allocation7 + $0x110] sm:$0xff] }
  0x5f   :  { %485 = vmatpush.msra.mxu0 %v480_v9  ;;  %508 = vmatpush.msra.mxu1 %v416_v10  ;;  %v419_v9 = vld [vmem:[#allocation7 + $0x80] sm:$0xff]  ;;  %v438_v10 = vld [vmem:[#allocation7 + $0x118] sm:$0xff] }
  0x60   :  { %531 = vmatpush.msra.mxu2 %v432_v11  ;;  %554 = vmatpush.msra.mxu3 %v448_v13  ;;  %v454_v11 = vld [vmem:[#allocation7 + $0x198] sm:$0xff]  ;;  %v453_v13 = vld [vmem:[#allocation7 + $0x190] sm:$0xff] }
  0x61   :  { %322 = vmatmul.f32.gmra.mxu0 %v835_v49  ;;  %345 = vmatmul.f32.gmra.mxu1 %v835_v49 }
  0x62   :  { %368 = vmatmul.f32.gmra.mxu2 %v835_v49  ;;  %391 = vmatmul.f32.gmra.mxu3 %v835_v49 }
  0x63   :  { %486 = vmatpush.msra.mxu0 %v479_v14  ;;  %509 = vmatpush.msra.mxu1 %v415_v15  ;;  %v436_v14 = vld [vmem:[#allocation7 + $0x108] sm:$0xff] }
  0x64   :  { %532 = vmatpush.msra.mxu2 %v431_v16  ;;  %555 = vmatpush.msra.mxu3 %v447_v46  ;;  %v452_v15 = vld [vmem:[#allocation7 + $0x188] sm:$0xff]  ;;  %v435_v16 = vld [vmem:[#allocation7 + $0x100] sm:$0xff] }
  0x65   :  { %487 = vmatpush.msra.mxu0 %v478_v17  ;;  %510 = vmatpush.msra.mxu1 %v414_v18  ;;  %v451_v17 = vld [vmem:[#allocation7 + $0x180] sm:$0xff] }
  0x66   :  { %533 = vmatpush.msra.mxu2 %v430_v19  ;;  %556 = vmatpush.msra.mxu3 %v446_v51 }
  0x67   :  { %488 = vmatpush.msra.mxu0 %v477_v20  ;;  %511 = vmatpush.msra.mxu1 %v413_v21 }
  0x68   :  { %534 = vmatpush.msra.mxu2 %v429_v22 }
  0x69   :  { %489 = vmatpush.msra.mxu0 %v476_v23  ;;  %512 = vmatpush.msra.mxu1 %v412_v24 }
  0x6a   :  { %535 = vmatpush.msra.mxu2 %v428_v45 }
  0x6b   :  { %490 = vmatpush.msra.mxu0 %v475_v25  ;;  %513 = vmatpush.msra.mxu1 %v411_v26 }
  0x6c   :  { %536 = vmatpush.msra.mxu2 %v427_v50 }
  0x6d   :  { %491 = vmatpush.msra.mxu0 %v474_v27  ;;  %514 = vmatpush.msra.mxu1 %v410_v28 }
  0x6e   :  { %537 = vmatpush.msra.mxu2 %v426_v54 }
  0x6f   :  { %492 = vmatpush.msra.mxu0 %v473_v29  ;;  %515 = vmatpush.msra.mxu1 %v409_v30 }
  0x71   :  { %493 = vmatpush.msra.mxu0 %v472_v31  ;;  %516 = vmatpush.msra.mxu1 %v408_v33 }
  0x73   :  { %494 = vmatpush.msra.mxu0 %v471_v34  ;;  %517 = vmatpush.msra.mxu1 %v407_v35 }
  0x75   :  { %495 = vmatpush.msra.mxu0 %v470_v36  ;;  %518 = vmatpush.msra.mxu1 %v406_v37 }
  0x77   :  { %496 = vmatpush.msra.mxu0 %v469_v38  ;;  %519 = vmatpush.msra.mxu1 %v405_v39 }
  0x79   :  { %497 = vmatpush.msra.mxu0 %v468_v40  ;;  %520 = vmatpush.msra.mxu1 %v404_v48 }
  0x7b   :  { %498 = vmatpush.msra.mxu0 %v467_v41  ;;  %521 = vmatpush.msra.mxu1 %v403_v53 }
  0x7c   :  { %499 = vmatmul.f32.vlgmr.msra.gmra.mxu0 %v829_v32  ;;  %v445_v32 = vld [vmem:[#allocation7 + $0x150] sm:$0xff] }
  0x7d   :  { %575 = vmatpush.msrb.mxu0 %v466_v42  ;;  %557 = vmatpush.msra.mxu3 %v445_v32 }
  0x7e   :  { %621 = vmatpush.msrb.mxu1 %v466_v42 }
  0x7f   :  { %576 = vmatpush.msrb.mxu0 %v465_v43  ;;  %558 = vmatpush.msra.mxu3 %v444_v56 }
  0x80   :  { %622 = vmatpush.msrb.mxu1 %v465_v43 }
  0x81   :  { %577 = vmatpush.msrb.mxu0 %v464_v44  ;;  %559 = vmatpush.msra.mxu3 %v443_v59 }
  0x82   :  { %623 = vmatpush.msrb.mxu1 %v464_v44 }
  0x83   :  { %578 = vmatpush.msrb.mxu0 %v463_v47  ;;  %560 = vmatpush.msra.mxu3 %v442_v62 }
  0x84   :  { %502 = vmatmul.f32.gmra.mxu0 %v835_v49  ;;  %v425_v49 = vld [vmem:[#allocation7 + $0xb0] sm:$0xff]  ;;  %624 = vmatpush.msrb.mxu1 %v463_v47 }
  0x85   :  { %579 = vmatpush.msrb.mxu0 %v462_v52  ;;  %538 = vmatpush.msra.mxu2 %v425_v49 }
  0x86   :  { %561 = vmatpush.msra.mxu3 %v441_v1  ;;  %625 = vmatpush.msrb.mxu1 %v462_v52 }
  0x87   :  { %580 = vmatpush.msrb.mxu0 %v461_v55  ;;  %539 = vmatpush.msra.mxu2 %v424_v58 }
  0x88   :  { %562 = vmatpush.msra.mxu3 %v440_v4  ;;  %626 = vmatpush.msrb.mxu1 %v461_v55 }
  0x89   :  { %581 = vmatpush.msrb.mxu0 %v460_v57  ;;  %540 = vmatpush.msra.mxu2 %v423_v61 }
  0x8a   :  { %563 = vmatpush.msra.mxu3 %v439_v7  ;;  %627 = vmatpush.msrb.mxu1 %v460_v57 }
  0x8b   :  { %582 = vmatpush.msrb.mxu0 %v459_v60  ;;  %541 = vmatpush.msra.mxu2 %v422_v0 }
  0x8c   :  { %564 = vmatpush.msra.mxu3 %v438_v10  ;;  %628 = vmatpush.msrb.mxu1 %v459_v60 }
  0x8d   :  { %583 = vmatpush.msrb.mxu0 %v458_v63  ;;  %542 = vmatpush.msra.mxu2 %v421_v3 }
  0x8e   :  { %565 = vmatpush.msra.mxu3 %v437_v12  ;;  %629 = vmatpush.msrb.mxu1 %v458_v63 }
  0x8f   :  { %584 = vmatpush.msrb.mxu0 %v457_v2  ;;  %543 = vmatpush.msra.mxu2 %v420_v6 }
  0x90   :  { %566 = vmatpush.msra.mxu3 %v436_v14  ;;  %630 = vmatpush.msrb.mxu1 %v457_v2 }
  0x91   :  { %585 = vmatpush.msrb.mxu0 %v456_v5  ;;  %544 = vmatpush.msra.mxu2 %v419_v9 }
  0x92   :  { %567 = vmatpush.msra.mxu3 %v435_v16  ;;  %631 = vmatpush.msrb.mxu1 %v456_v5 }
  0x93   :  { %586 = vmatpush.msrb.mxu0 %v455_v8 }
  0x94   :  { %632 = vmatpush.msrb.mxu1 %v455_v8 }
  0x95   :  { %587 = vmatpush.msrb.mxu0 %v454_v11 }
  0x96   :  { %633 = vmatpush.msrb.mxu1 %v454_v11 }
  0x97   :  { %588 = vmatpush.msrb.mxu0 %v453_v13 }
  0x98   :  { %634 = vmatpush.msrb.mxu1 %v453_v13 }
  0x99   :  { %589 = vmatpush.msrb.mxu0 %v452_v15 }
  0x9a   :  { %635 = vmatpush.msrb.mxu1 %v452_v15 }
  0x9b   :  { %590 = vmatpush.msrb.mxu0 %v451_v17 }
  0x9c   :  { %636 = vmatpush.msrb.mxu1 %v451_v17 }
  0xc2   :  { %v228_v18 = vpop.f32.mrf.mxu0  ;;  %v251_v19 = vpop.f32.mrf.mxu1 }
  0xc9   :  { %v274_v20 = vpop.f32.mrf.mxu2  ;;  %v297_v21 = vpop.f32.mrf.mxu3 }
  0xcc   :  { %v231_v22 = vpop.f32.mrf.mxu0  ;;  %v254_v23 = vpop.f32.mrf.mxu1 }
  0xd3   :  { %v277_v24 = vpop.f32.mrf.mxu2  ;;  %v300_v25 = vpop.f32.mrf.mxu3 }
  0xd6   :  { %v320_v26 = vpop.f32.mrf.mxu0  ;;  %v343_v27 = vpop.f32.mrf.mxu1 }
  0xd7   :  { %v395_v28 = vmul.f32 %v320_v26, %v228_v18  ;;  %v396_v29 = vmul.f32 %v343_v27, %v251_v19 }
  0xd9   :  { %522 = vmatmul.f32.vlgmr.msra.gmra.mxu1 %v395_v28  ;;  %545 = vmatmul.f32.vlgmr.msra.gmra.mxu2 %v396_v29 }
  0xdd   :  { %v366_v30 = vpop.f32.mrf.mxu2  ;;  %v389_v31 = vpop.f32.mrf.mxu3 }
  0xde   :  { %v397_v33 = vmul.f32 %v366_v30, %v274_v20  ;;  %v398_v34 = vmul.f32 %v389_v31, %v297_v21  ;;  %v323_v35 = vpop.f32.mrf.mxu0  ;;  %v346_v36 = vpop.f32.mrf.mxu1 }
  0xdf   :  { %v399_v37 = vmul.f32 %v323_v35, %v231_v22  ;;  %v400_v38 = vmul.f32 %v346_v36, %v254_v23 }
  0xe0   :  { %568 = vmatmul.f32.vlgmr.msra.gmra.mxu3 %v397_v33  ;;  %591 = vmatmul.f32.vlgmr.msrb.gmra.mxu0 %v398_v34 }
  0xe1   :  { %525 = vmatmul.f32.gmra.mxu1 %v399_v37  ;;  %548 = vmatmul.f32.gmra.mxu2 %v400_v38 }
  0xe5   :  { %v369_v39 = vpop.f32.mrf.mxu2  ;;  %v392_v40 = vpop.f32.mrf.mxu3 }
  0xe6   :  { %v401_v41 = vmul.f32 %v369_v39, %v277_v24  ;;  %v402_v42 = vmul.f32 %v392_v40, %v300_v25 }
  0xe8   :  { %571 = vmatmul.f32.gmra.mxu3 %v401_v41 }
  0xe9   :  { %594 = vmatmul.f32.vlgmr.msrb.gmra.mxu1 %v402_v42 }
  0xf9   :  { %v500_v43 = vpop.f32.mrf.mxu0 }
 0x101   :  { %v503_v45 = vpop.f32.mrf.mxu0 }
 0x156   :  { %v523_v44 = vpop.f32.mrf.mxu1 }
 0x157   :  { %v524_v47 = vadd.f32 %v523_v44, %v500_v43 }
 0x15c   :  { %v546_v46 = vpop.f32.mrf.mxu2 }
 0x15d   :  { %v547_v48 = vadd.f32 %v546_v46, %v524_v47  ;;  %v592_v53 = vpop.f32.mrf.mxu0 }
 0x15e   :  { %v526_v50 = vpop.f32.mrf.mxu1 }
 0x15f   :  { %v527_v55 = vadd.f32 %v526_v50, %v503_v45 }
 0x163   :  { %v569_v51 = vpop.f32.mrf.mxu3 }
 0x164   :  { %v570_v52 = vadd.f32 %v569_v51, %v547_v48  ;;  %v549_v32 = vpop.f32.mrf.mxu2 }
 0x165   :  { %v550_v49 = vadd.f32 %v549_v32, %v527_v55 }
 0x166   :  { %v593_v54 = vadd.f32 %v592_v53, %v570_v52  ;;  %v595_v58 = vpop.f32.mrf.mxu1 }
 0x168   :  { %598 = vst [vmem:[#allocation10] sm:$0xff] %v593_v54 }
 0x16b   :  { %v572_v56 = vpop.f32.mrf.mxu3 }
 0x16c   :  { %v573_v57 = vadd.f32 %v572_v56, %v550_v49 }
 0x16e   :  { %v596_v59 = vadd.f32 %v595_v58, %v573_v57 }
 0x170   :  { %599 = vst [vmem:[#allocation10 + $0x8] sm:$0xff] %v596_v59 }
 0x171   :  { %612 = dma.vmem_to_hbm [thread:$0]  %s605_s3, 256, %s607_s13, [#allocation4], %s778_s27, %s778_s27, %s779_s28  }
 0x172   :  { %772 = dma.done.wait [#allocation4], 256  }
 0x173   :  { %773 = vsyncadd [#allocation4], 4294967040 }
 0x174   :  { %617 = vsyncpa [#allocation3], 1 }
 0x175   :  { %618 = vsyncpa [#allocation6], 1 }
 0x176   :  { %619 = vsyncpa [#allocation9], 1 }
 0x177   :  { %620 = vsyncpa [#allocation4], 1 }

</bundles_post_ra>
